<compile_context>
chip_gen: v7x
topology: tpu7x:2x2x1
jax: 0.10.0
libtpu: 0.0.40
codegen_flags: <defaults>
</compile_context>

<pallas_src>
import numpy as np
import jax
import jax.numpy as jnp
from jax.experimental import pallas as pl
from jax.experimental.pallas import tpu as pltpu


def _vmem_budget_bytes():
    """Per-generation scoped-VMEM budget for this kernel's pipeline."""
    try:
        info = pltpu.get_tpu_info()
        vmem = getattr(info, "vmem_capacity_bytes", 128 * 1024 * 1024)
    except Exception:
        vmem = 128 * 1024 * 1024
    if vmem <= 64 * 1024 * 1024:      # v7x: 64 MiB per TensorCore
        return 40 * 1024 * 1024
    return 64 * 1024 * 1024           # v5e / v6e: 128 MiB physical VMEM


def _choose_blocks(B, F, bytes_per_elem, vmem_budget_bytes):
    """Fixed, VMEM-budgeted tile shapes; the grid uses pl.cdiv (ragged OK)."""
    # 3 data streams (x0, x1, out) x 2 pipeline buffers = 6 live data tiles.
    tile_budget = vmem_budget_bytes // 6

    # Rows: full batch when small (block == full extent is always legal),
    # otherwise a fixed 256 (multiple of 8 and 16 -> fine for f32 and bf16).
    br = B if B <= 256 else 256

    # Columns: full rows when they fit the per-stream budget (maximal
    # contiguous DMA, widest lane-dense vst); otherwise a fixed lane-aligned
    # width sized to the budget.  cdiv + masking handles any ragged tail.
    if br * F * bytes_per_elem <= tile_budget:
        bc = F
    else:
        bc = (tile_budget // (br * bytes_per_elem)) // 128 * 128
        bc = max(128, min(bc, F))

    # v7x megacore: ensure >= 2 grid steps so both TensorCores participate.
    if pl.cdiv(B, br) * pl.cdiv(F, bc) < 2:
        if F >= 256:
            bc = pl.cdiv(pl.cdiv(F, 2), 128) * 128
        elif B >= 16:
            br = pl.cdiv(pl.cdiv(B, 2), 8) * 8
    return br, bc


def _noiser_kernel(coef_ref, x0_ref, x1_ref, out_ref):
    # coef_ref: VMEM (br, 2) per-example [coef0, coef1] columns (f32).
    # x0_ref / x1_ref / out_ref: VMEM (br, bc) data tiles (f32 or bf16).
    # (br, 1) * (br, bc) is a free VPU lane-broadcast; FMA runs in f32.
    c0 = coef_ref[:, 0:1]
    c1 = coef_ref[:, 1:2]
    x0 = x0_ref[...].astype(jnp.float32)
    x1 = x1_ref[...].astype(jnp.float32)
    out_ref[...] = (c0 * x0 + c1 * x1).astype(out_ref.dtype)
    # TODO(synk): 'var' stochastic branch (ode=False) not implemented because
    # BaseNoiser's abstract coefficient() defines no 'var' entry.


def base_noiser_forward(x_0, x_1, t, training_timesteps, ode=True):
    """x_0, x_1: (B, C, H, W) float32 or bfloat16.  t: (B,) int32 timesteps."""
    assert ode, "only the deterministic (ode=True) path is implemented"
    B, C, H, W = x_0.shape
    F = C * H * W

    # coefficient(t) — deterministic linear schedule (plain-JAX glue).
    # TODO(synk): real subclasses override coefficient(); plug their schedule here.
    t_norm = t.astype(jnp.float32) / jnp.float32(training_timesteps)
    coef = jnp.stack([1.0 - t_norm, t_norm], axis=-1).astype(jnp.float32)  # (B, 2)

    x0f = x_0.reshape(B, F)
    x1f = x_1.reshape(B, F)

    vmem_budget = _vmem_budget_bytes()
    br, bc = _choose_blocks(B, F, x_0.dtype.itemsize, vmem_budget)
    grid = (pl.cdiv(B, br), pl.cdiv(F, bc))

    data_spec = pl.BlockSpec((br, bc), lambda i, j: (i, j))
    coef_spec = pl.BlockSpec((br, 2), lambda i, j: (i, 0))

    out = pl.pallas_call(
        _noiser_kernel,
        out_shape=jax.ShapeDtypeStruct((B, F), x_0.dtype),
        grid=grid,
        in_specs=[coef_spec, data_spec, data_spec],
        out_specs=data_spec,
        compiler_params=pltpu.CompilerParams(
            dimension_semantics=("parallel", "parallel"),
            vmem_limit_bytes=vmem_budget,
        ),
    )(coef, x0f, x1f)

    return out.reshape(B, C, H, W)


if __name__ == "__main__":
    key = jax.random.PRNGKey(0)
    k0, k1, kt = jax.random.split(key, 3)

    B, C, H, W = 2, 4, 16, 16
    training_timesteps = 16

    x_0 = jax.random.normal(k0, (B, C, H, W), dtype=jnp.float32)
    x_1 = jax.random.normal(k1, (B, C, H, W), dtype=jnp.float32)
    t = jax.random.randint(kt, (B,), 0, training_timesteps, dtype=jnp.int32)

    # Pure-JAX reference (mirrors the PyTorch broadcast semantics).
    def ref_fn(a, b, tt):
        tn = tt.astype(jnp.float32) / jnp.float32(training_timesteps)
        return ((1.0 - tn)[:, None, None, None] * a.astype(jnp.float32)
                + tn[:, None, None, None] * b.astype(jnp.float32))

    # f32 path.
    x_t = jax.block_until_ready(
        base_noiser_forward(x_0, x_1, t, training_timesteps, ode=True))
    np.testing.assert_allclose(np.asarray(x_t), np.asarray(ref_fn(x_0, x_1, t)),
                               rtol=1e-6, atol=1e-6)

    # bf16 I/O path (f32 compute in-kernel, bf16 loads/stores).
    x0b, x1b = x_0.astype(jnp.bfloat16), x_1.astype(jnp.bfloat16)
    x_tb = jax.block_until_ready(
        base_noiser_forward(x0b, x1b, t, training_timesteps, ode=True))
    np.testing.assert_allclose(np.asarray(x_tb, dtype=np.float32),
                               np.asarray(ref_fn(x0b, x1b, t)),
                               rtol=2e-2, atol=2e-2)

    print("KERNEL_OK")
</pallas_src>

<mosaic_0001>
module attributes {stable_mosaic.version = 11 : i64} {
  func.func @_noiser_kernel(%arg0: i32, %arg1: i32, %arg2: memref<2x2xf32, #tpu.memory_space<vmem>>, %arg3: memref<2x512xf32, #tpu.memory_space<vmem>>, %arg4: memref<2x512xf32, #tpu.memory_space<vmem>>, %arg5: memref<2x512xf32, #tpu.memory_space<vmem>>) attributes {dimension_semantics = [#tpu.dimension_semantics<parallel>, #tpu.dimension_semantics<parallel>], iteration_bounds = array<i64: 1, 2>, scalar_prefetch = 0 : i64, scratch_operands = 0 : i64, tpu.core_type = #tpu.core_type<tc>, window_params = [{transform_indices = @transform_0, window_bounds = array<i64: 2, 2>}, {transform_indices = @transform_1, window_bounds = array<i64: 2, 512>}, {transform_indices = @transform_2, window_bounds = array<i64: 2, 512>}, {transform_indices = @transform_3, window_bounds = array<i64: 2, 512>}]} {
    %c0 = arith.constant 0 : index
    %c0_0 = arith.constant 0 : index
    %0 = vector.load %arg2[%c0, %c0_0] : memref<2x2xf32, #tpu.memory_space<vmem>>, vector<2x1xf32>
    %c0_1 = arith.constant 0 : index
    %c1 = arith.constant 1 : index
    %1 = vector.load %arg2[%c0_1, %c1] : memref<2x2xf32, #tpu.memory_space<vmem>>, vector<2x1xf32>
    %c0_2 = arith.constant 0 : index
    %c0_3 = arith.constant 0 : index
    %2 = vector.load %arg3[%c0_2, %c0_3] : memref<2x512xf32, #tpu.memory_space<vmem>>, vector<2x512xf32>
    %c0_4 = arith.constant 0 : index
    %c0_5 = arith.constant 0 : index
    %3 = vector.load %arg4[%c0_4, %c0_5] : memref<2x512xf32, #tpu.memory_space<vmem>>, vector<2x512xf32>
    %4 = vector.broadcast %0 : vector<2x1xf32> to vector<2x512xf32>
    %5 = arith.mulf %4, %2 : vector<2x512xf32>
    %6 = vector.broadcast %1 : vector<2x1xf32> to vector<2x512xf32>
    %7 = arith.mulf %6, %3 : vector<2x512xf32>
    %8 = arith.addf %5, %7 : vector<2x512xf32>
    %c0_6 = arith.constant 0 : index
    %c0_7 = arith.constant 0 : index
    %9 = vector.load %arg5[%c0_6, %c0_7] : memref<2x512xf32, #tpu.memory_space<vmem>>, vector<2x512xf32>
    tpu.vector_store %arg5[%c0_6, %c0_7], %8 {strides = array<i32>} : memref<2x512xf32, #tpu.memory_space<vmem>>, vector<2x512xf32>,
    return
  }
  func.func @transform_0(%arg0: i32, %arg1: i32) -> (i32, i32) {
    %c0_i32 = arith.constant 0 : i32
    %c0_i32_0 = arith.constant 0 : i32
    return %arg0, %c0_i32 : i32, i32
  }
  func.func @transform_1(%arg0: i32, %arg1: i32) -> (i32, i32) {
    %c0_i32 = arith.constant 0 : i32
    return %arg0, %arg1 : i32, i32
  }
  func.func @transform_2(%arg0: i32, %arg1: i32) -> (i32, i32) {
    %c0_i32 = arith.constant 0 : i32
    return %arg0, %arg1 : i32, i32
  }
  func.func @transform_3(%arg0: i32, %arg1: i32) -> (i32, i32) {
    %c0_i32 = arith.constant 0 : i32
    return %arg0, %arg1 : i32, i32
  }
}

</mosaic_0001>

<bundles_post_ra>
// kernel: tpu_custom_call.1
= control target key start
LH: loop header
LB: loop body
LE: loop exit
PB: predicated region body
PF: predicated region fallthrough
CT: control target
= control target key end

     0   :  { %8 = vsyncpa [#allocation3], 0  ;;  %s1064_s0 = inlined_call_operand.hbm [shape: f32[2,2], index: 0, kind: input, shape index: {}]   ;;  %s1065_s1 = inlined_call_operand.hbm [shape: f32[2,1024], index: 1, kind: input, shape index: {}]   ;;  %s1066_s2 = inlined_call_operand.hbm [shape: f32[2,1024], index: 2, kind: input, shape index: {}]   ;;  %s1067_s3 = inlined_call_operand.hbm [shape: f32[2,1024], index: 3, kind: output, shape index: {}]  }
   0x1   :  { %9 = vsyncpa [#allocation6], 0 }
   0x2   :  { %11 = vsyncpa [#allocation6 + $0x1], 0 }
   0x3   :  { %12 = vsyncpa [#allocation4], 0 }
   0x4   :  { %14 = vsyncpa [#allocation4 + $0x1], 0  ;;  %s808_s12 = smov 0   ;;  %s810_s13 = smov 0  }
   0x5   :  { %s812_s14 = smov 0   ;;  %s814_s15 = smov 0  }
   0x6   :  { %s816_s16 = smov 0   ;;  %s818_s17 = smov 0  }
   0x7 LB: > { %s29_s18 = sadd.s32 1, %s775_s16  ;;  %s67_s19 = sadd.s32 1, %s767_s14  ;;  %s779_s17 = sphi %s818_s17, %s20_s17   ;;  %s775_s16 = sphi %s816_s16, %s1093_s16   ;;  %s771_s15 = sphi %s814_s15, %s1092_s15   ;;  %s767_s14 = sphi %s812_s14, %s1091_s14   ;;  %s763_s13 = sphi %s810_s13, %s1090_s13   ;;  %s759_s12 = sphi %s808_s12, %s1089_s12  }
   0x8   : > { %p30_p0 = scmp.ge.s32.totalorder %s29_s18, 2  ;;  %p74_p1 = scmp.ne.s32.totalorder %s767_s14, %s763_s13 }
   0x9   : > { %p75_p2 = scmp.eq.s32.totalorder %s779_s17, 0  ;;  %p546_p5 = scmp.lt.s32.totalorder %s779_s17, 2 }
   0xa   : > { %s1095_s18 = smov (%p30_p0, %s29_s18), 0  ;;  %s173_s21 = sand.u32 1, %s779_s17  }
   0xb   : > { %p76_p4 = por %p75_p2, %p74_p1  ;;  %s63_s20 = ssub.s32 %s775_s16, %s1095_s18 }
   0xc   : > { %p65_p6 = scmp.eq.s32.totalorder %s63_s20, 0  ;;  %s175_s22 = sand.u32 1, %s767_s14  }
   0xd   : > { %s517_s23 = sshll.u32 %s775_s16, 7  ;;  %s858_s25 = sshll.u32 %s175_s22, 3 }
   0xe   : > { %s856_s24 = scalar_select %p65_p6, %s767_s14, %s67_s19  }
   0xf   : > { %s865_s28 = scalar_lea.hbm %s1065_s1, %s517_s23  ;;  %p867_p7 = pnand %p546_p5, %p76_p4 }
  0x10   : > { %s177_s30 = scalar_lea.vmem [#allocation5], %s858_s25  ;;  %s874_s5 = scalar_lea.sflag [#allocation6], %s173_s21 }
  0x11   : > { %s187_s4 = sshll.u32 %s177_s30, 4  ;;  %s605_s6 = scalar_lea.hbm %s865_s28, 128  ;;  %s872_s4 = int_to_ptr.vmem [resolvable:$true] %s187_s4 }
  0x12   : > { %p606_p8 = scmp.ne.s32.totalorder %s865_s28, %s605_s6  ;;  %p607_p9 = pneg %p867_p7 }
  0x13   : > { %s610_s9 = scalar_lea.hbm %s1065_s1, 256  ;;  %p611_p12 = scmp.lt.u32.totalorder %s865_s28, %s1065_s1 }
  0x14   : > { %p608_p10 = pnand %p607_p9, %p606_p8  ;;  %p612_p13 = scmp.lt.u32.totalorder %s610_s9, %s605_s6 }
  0x15   : > { %p614_p2 = scmp.lt.u32.totalorder %s605_s6, %s865_s28 }
  0x16   : > { %p609_p11 = pneg %p608_p10  ;;  %p613_p0 = por %p612_p13, %p611_p12 }
  0x18   : > { %p615_p4 = por %p614_p2, %p613_p0 }
  0x1a   : > { %p616_p5 = pnand %p615_p4, %p609_p11 }
  0x1c   : > { %619 = shalt.err (!%p616_p5)
}
  0x1d   : > { %s620_s19 = scalar_lea.vmem %s872_s4, 128  ;;  %s781_s20 = smov [#allocation5]  }
  0x1e   : > { %p621_p6 = scmp.ne.s32.totalorder %s872_s4, %s620_s19  ;;  %s625_s21 = sshll.u32 %s781_s20, 4  ;;  %s626_s21 = int_to_ptr.vmem [resolvable:$false] %s625_s21 }
  0x1f   : > { %s627_s22 = scalar_lea.vmem %s626_s21, 256  ;;  %p628_p3 = scmp.lt.s32.totalorder %s872_s4, %s626_s21 }
  0x20   : > { %p623_p8 = pnand %p621_p6, %p607_p9  ;;  %p629_p12 = scmp.lt.s32.totalorder %s627_s22, %s620_s19 }
  0x22   : > { %p624_p10 = pneg %p623_p8  ;;  %p630_p13 = por %p629_p12, %p628_p3 }
  0x24   : > { %p631_p0 = pnand %p630_p13, %p624_p10 }
  0x26   : > { %634 = shalt.err (!%p631_p0)
}
  0x27   : > { %537 = dma.hbm_to_vmem [thread:$0]  (!%p867_p7), %s865_s28, 128, %s872_s4, %s874_s5  }
  0x28   : > { %s903_s26 = sadd.s32 4294967295, %s779_s17   ;;  %s497_s27 = sadd.s32 4294967294, %s779_s17  }
  0x29   : > { %p80_p3 = scmp.ne.s32.totalorder %s763_s13, %s759_s12  ;;  %p1068_p11 = scmp.eq.s32.totalorder %s903_s26, 0 }
  0x2a   : > { %p134_p2 = scmp.eq.s32.totalorder %s903_s26, 1  ;;  %p140_p4 = scmp.eq.s32.totalorder %s497_s27, 1 }
  0x2b   : > { %p498_p5 = scmp.ge.s32.totalorder %s779_s17, 1  ;;  %p913_p6 = por %p1068_p11, %p80_p3 }
  0x2c   : > { %p920_p8 = por %p134_p2, %p74_p1  ;;  %p924_p10 = por %p140_p4, %p80_p3 }
  0x2d   : > { %s1074_s30 = scalar_select %p913_p6, 1, 0 }
  0x2e   : > { %s1075_s28 = scalar_select %p920_p8, 1, 0 }
  0x2f   : > { %s1076_s4 = scalar_select %p924_p10, 1, 0 }
  0x30   : > { %p147_p12 = scmp.lt.s32.totalorder %s779_s17, 3  ;;  %s934_s8 = scalar_lea.hbm %s1066_s2, %s517_s23 }
  0x31   : > { %s782_s10 = smov [#allocation2]   ;;  %s198_s19 = scalar_lea.vmem [#allocation7], %s858_s25 }
  0x32   : > { %p936_p13 = pnand %p498_p5, %p147_p12  ;;  %s940_s11 = sshll.u32 %s782_s10, 4  ;;  %s163_s11 = int_to_ptr.vmem [resolvable:$true] %s940_s11 }
  0x33   : > { %s208_s20 = sshll.u32 %s198_s19, 4  ;;  %s635_s21 = scalar_lea.hbm %s934_s8, 128  ;;  %s209_s20 = int_to_ptr.vmem [resolvable:$true] %s208_s20 }
  0x34   : > { %s1077_s9 = scalar_select %p936_p13, 1, 0 }
  0x35   : > { %p636_p0 = scmp.ne.s32.totalorder %s934_s8, %s635_s21  ;;  %s640_s27 = scalar_lea.hbm %s1066_s2, 256 }
  0x36   : > { %p641_p4 = scmp.lt.u32.totalorder %s934_s8, %s1066_s2  ;;  %p642_p5 = scmp.lt.u32.totalorder %s640_s27, %s635_s21 }
  0x37   : > { %p638_p3 = pnand %p636_p0, %p607_p9  ;;  %p644_p11 = scmp.lt.u32.totalorder %s635_s21, %s934_s8 }
  0x38   : > { %p643_p12 = por %p642_p5, %p641_p4 }
  0x39   : > { %p639_p2 = pneg %p638_p3 }
  0x3a   : > { %p645_p10 = por %p644_p11, %p643_p12 }
  0x3c   : > { %p646_p1 = pnand %p645_p10, %p639_p2 }
  0x3e   : > { %649 = shalt.err (!%p646_p1)
}
  0x3f   : > { %s650_s25 = scalar_lea.vmem %s209_s20, 128  ;;  %s783_s10 = smov [#allocation7]  }
  0x40   : > { %p651_p8 = scmp.ne.s32.totalorder %s209_s20, %s650_s25  ;;  %s655_s19 = sshll.u32 %s783_s10, 4  ;;  %s656_s19 = int_to_ptr.vmem [resolvable:$false] %s655_s19 }
  0x41   : > { %s657_s23 = scalar_lea.vmem %s656_s19, 256  ;;  %p658_p6 = scmp.lt.s32.totalorder %s209_s20, %s656_s19 }
  0x42   : > { %p653_p0 = pnand %p651_p8, %p607_p9  ;;  %p659_p13 = scmp.lt.s32.totalorder %s657_s23, %s650_s25 }
  0x44   : > { %p654_p3 = pneg %p653_p0  ;;  %p660_p4 = por %p659_p13, %p658_p6 }
  0x46   : > { %p661_p5 = pnand %p660_p4, %p654_p3 }
  0x48   : > { %664 = shalt.err (!%p661_p5)
}
  0x49   : > { %540 = dma.hbm_to_vmem [thread:$0]  (!%p867_p7), %s934_s8, 128, %s209_s20, %s874_s5  }
  0x4a   : > { %p1078_p9 = scmp.eq.s32.totalorder %s903_s26, 0  ;;  %p1079_p11 = scmp.ne.s32.totalorder %s1077_s9, 0 }
  0x4b   : > { %s665_s6 = scalar_lea.hbm %s1064_s0, 32 }
  0x4c   : > { %p1080_p8 = pneg %p1079_p11  ;;  %p666_p6 = scmp.ne.s32.totalorder %s1064_s0, %s665_s6 }
  0x4d   : > { %p672_p2 = scmp.lt.u32.totalorder %s665_s6, %s1064_s0 }
  0x4e   : > { %p971_p10 = pnand %p1080_p8, %p1078_p9 }
  0x50   : > { %p667_p13 = pneg %p971_p10 }
  0x52   : > { %p668_p7 = pnand %p667_p13, %p666_p6 }
  0x54   : > { %p669_p1 = pneg %p668_p7 }
  0x56   : > { %p674_p12 = pnand %p672_p2, %p669_p1 }
  0x58   : > { %677 = shalt.err (!%p674_p12)
}
  0x59   : > { %s678_s20 = scalar_lea.vmem %s163_s11, 32  ;;  %p686_p5 = scmp.lt.s32.totalorder %s163_s11, %s163_s11 }
  0x5a   : > { %p679_p0 = scmp.ne.s32.totalorder %s163_s11, %s678_s20  ;;  %p687_p9 = scmp.lt.s32.totalorder %s678_s20, %s678_s20 }
  0x5c   : > { %p681_p3 = pnand %p679_p0, %p667_p13  ;;  %p688_p8 = por %p687_p9, %p686_p5 }
  0x5e   : > { %p682_p4 = pneg %p681_p3 }
  0x60   : > { %p689_p11 = pnand %p688_p8, %p682_p4 }
  0x62   : > { %692 = shalt.err (!%p689_p11)
}
  0x63   : > { %533 = dma.hbm_to_vmem [thread:$0]  (!%p971_p10), %s1064_s0, 32, %s163_s11, [#allocation3]  }
  0x64   : > { %p1082_p6 = scmp.ne.s32.totalorder %s1077_s9, 0 }
  0x65   : > { %p1083_p7 = scmp.eq.s32.totalorder (!%p1082_p6), %s903_s26, 0 }
  0x66   : > { %217 = sbr.rel (%p1082_p6) target bundleno = 274 (0x112), region = 32 }
  0x6d   : > { %746 = dma.done.wait (%p1083_p7), [#allocation3], 32   ;;  %p1084_p13 = pmov %p1083_p7 }
  0x6e   : > { %s223_s19 = sand.u32 1, %s903_s26   ;;  %s225_s23 = sand.u32 1, %s763_s13  }
  0x6f   : > { %748 = vsyncadd (%p1084_p13), [#allocation3], 4294967264  ;;  %s1001_s21 = sshll.u32 %s225_s23, 3  ;;  %s224_s11 = scalar_lea.sflag [#allocation6], %s223_s19 }
  0x70   : > { %s227_s22 = scalar_lea.vmem [#allocation5], %s1001_s21  ;;  %p1085_p11 = scmp.ne.s32.totalorder %s1074_s30, 0 }
  0x72   : > { %750 = dma.done.wait (%p1085_p11), %s224_s11, 256  }
  0x73   : > { %752 = vsyncadd (%p1085_p11), %s224_s11, 4294967040  ;;  %v784_v0 = vmov 0   ;;  %v267_v1 = vld [vmem:[#allocation2] sm:$0x3]  ;;  %v785_v2 = vmov 1   ;;  %v280_v5 = vlaneseq  ;;  %v268_v8 = vld [vmem:[%s227_s22] sm:$0xff] }
  0x74   : > { %601 = vset.pattern.permute.xlu0 %v784_v0  ;;  %v786_v3 = vmov 1983009808   ;;  %s236_s26 = scalar_lea.vmem [#allocation7], %s1001_s21  ;;  %v276_v10 = vcombine.high %v268_v8, %v268_v8  ;;  %s519_s30 = sshll.u32 %s771_s15, 7 }
  0x75   : > { %272 = vperm.xlu0 %601, %v267_v1   ;;  %v278_v4 = vunpack.c.l.s4 %v786_v3  ;;  %v281_v7 = vshrl.u32 %v280_v5, 7  ;;  %v269_v9 = vld [vmem:[%s236_s26] sm:$0xff]  ;;  %s263_s9 = scalar_lea.vmem [#allocation8], %s1001_s21  ;;  %s1014_s7 = scalar_lea.hbm %s1067_s3, %s519_s30 }
  0x76   : > { %v306_v12 = vcombine.high %v269_v9, %v269_v9  ;;  %s375_s27 = sshll.u32 %s263_s9, 4  ;;  %s359_s5 = scalar_lea.sflag [#allocation4], %s225_s23  ;;  %s1016_s27 = int_to_ptr.vmem [resolvable:$true] %s375_s27 }
  0x77   : > { %v279_v6 = vunpack.c.0.s8 %v278_v4  ;;  %s693_s8 = scalar_lea.vmem %s1016_s27, 128  ;;  %p1086_p1 = scmp.ne.s32.totalorder %s1075_s28, 0 }
  0x78   : > { %p694_p10 = scmp.ne.s32.totalorder %s1016_s27, %s693_s8  ;;  %s787_s15 = smov [#allocation8]  }
  0x79   : > { %602 = vset.pattern.permute.xlu0 %v785_v2  ;;  %v282_v11 = vsub.s32 %v279_v6, %v281_v7  ;;  %s697_s20 = sshll.u32 %s787_s15, 4  ;;  %s698_s20 = int_to_ptr.vmem [resolvable:$false] %s697_s20 }
  0x7a   : > { %302 = vperm.xlu0 %602, %v267_v1   ;;  %p695_p2 = pnand %p694_p10, %p1086_p1  ;;  %s699_s25 = scalar_lea.vmem %s698_s20, 256 }
  0x7b   : > { %v283_v13 = vrot.slane %v268_v8, %v282_v11  ;;  %v290_v14 = vrot.slane %v276_v10, %v282_v11  ;;  %v313_v15 = vrot.slane %v269_v9, %v282_v11  ;;  %v320_v16 = vrot.slane %v306_v12, %v282_v11  ;;  %p700_p0 = scmp.lt.s32.totalorder %s1016_s27, %s698_s20  ;;  %p701_p3 = scmp.lt.s32.totalorder %s699_s25, %s693_s8 }
  0x7c   : > { %p696_p12 = pneg %p695_p2 }
  0x7d   : > { %v291_v18 = vcombine.high %v283_v13, %v283_v13  ;;  %v292_v19 = vcombine.high %v290_v14, %v290_v14  ;;  %v321_v20 = vcombine.high %v313_v15, %v313_v15  ;;  %v322_v21 = vcombine.high %v320_v16, %v320_v16  ;;  %p702_p4 = por %p701_p3, %p700_p0 }
  0x7f   : > { %p703_p5 = pnand %p702_p4, %p696_p12 }
  0xf4   : > { %v273_v17 = vpop.permute.xlu0 %272 }
  0xf5   : > { %v297_v22 = vmul.f32 %v283_v13, %v273_v17  ;;  %v298_v23 = vmul.f32 %v291_v18, %v273_v17  ;;  %v299_v24 = vmul.f32 %v290_v14, %v273_v17  ;;  %v300_v25 = vmul.f32 %v292_v19, %v273_v17 }
  0xf9   : > { %v303_v26 = vpop.permute.xlu0 %302 }
  0xfa   : > { %v327_v27 = vmul.f32 %v313_v15, %v303_v26  ;;  %v328_v28 = vmul.f32 %v321_v20, %v303_v26  ;;  %v329_v29 = vmul.f32 %v320_v16, %v303_v26  ;;  %v330_v30 = vmul.f32 %v322_v21, %v303_v26 }
  0xfc   : > { %v331_v31 = vadd.f32 %v327_v27, %v297_v22  ;;  %v332_v32 = vadd.f32 %v328_v28, %v298_v23  ;;  %v333_v33 = vadd.f32 %v329_v29, %v299_v24  ;;  %v334_v34 = vadd.f32 %v330_v30, %v300_v25 }
  0xfe   : > { %v339_v35 = vcombine.low %v331_v31, %v332_v32  ;;  %v340_v36 = vcombine.low %v333_v33, %v334_v34 }
 0x100   : > { %v347_v37 = vrot.slane %v339_v35, %v282_v11  ;;  %v354_v38 = vrot.slane %v340_v36, %v282_v11 }
 0x102   : > { %v355_v39 = vcombine.low %v347_v37, %v354_v38 }
 0x104   : > { %357 = vst [vmem:[%s263_s9] sm:$0xff] %v355_v39 }
 0x105   : > { %706 = shalt.err (!%p703_p5)
}
 0x106   : > { %s707_s10 = scalar_lea.hbm %s1014_s7, 128  ;;  %s711_s21 = scalar_lea.hbm %s1067_s3, 256 }
 0x107   : > { %p708_p9 = scmp.ne.s32.totalorder %s1014_s7, %s707_s10  ;;  %p712_p7 = scmp.lt.u32.totalorder %s1014_s7, %s1067_s3 }
 0x108   : > { %p713_p13 = scmp.lt.u32.totalorder %s711_s21, %s707_s10  ;;  %p715_p10 = scmp.lt.u32.totalorder %s707_s10, %s1014_s7 }
 0x109   : > { %p709_p8 = pnand %p708_p9, %p1086_p1 }
 0x10a   : > { %p714_p11 = por %p713_p13, %p712_p7 }
 0x10b   : > { %p710_p6 = pneg %p709_p8 }
 0x10c   : > { %p716_p2 = por %p715_p10, %p714_p11 }
 0x10e   : > { %p717_p12 = pnand %p716_p2, %p710_p6 }
 0x110   : > { %720 = shalt.err (!%p717_p12)
}
 0x111   : > { %528 = dma.vmem_to_hbm [thread:$0]  (%p1086_p1), %s1016_s27, 128, %s1014_s7, %s359_s5  }
 0x112 PF: > { %s387_s26 = sand.u32 1, %s759_s12   ;;  %p1087_p0 = scmp.ne.s32.totalorder %s1076_s4, 0 }
 0x113   : > { %p1088_p3 = scmp.ge.s32.totalorder %s779_s17, 2  ;;  %s388_s30 = scalar_lea.sflag [#allocation4], %s387_s26 }
 0x115   : > { %p542_p4 = pnand %p1088_p3, %p1087_p0 }
 0x117   : > { %754 = dma.done.wait (!%p542_p4), %s388_s30, 128  }
 0x118   : > { %756 = vsyncadd (!%p542_p4), %s388_s30, 4294967168  ;;  %s20_s17 = sadd.s32 1, %s779_s17   ;;  %s1089_s12 = smov %s763_s13 }
 0x119   : > { %p17_p5 = scmp.ge.s32.totalorder %s20_s17, 4   ;;  %s1090_s13 = smov %s767_s14 }
 0x11a   : > { %s1091_s14 = smov %s856_s24  ;;  %s1092_s15 = smov %s775_s16 }
 0x11b   : > { %s1093_s16 = smov %s1095_s18  ;;  %19 = sbr.rel (!%p17_p5) target bundleno = 7 (0x7), region = 94 }
 0x122   :  { %393 = vsyncpa [#allocation3], 1 }
 0x123   :  { %395 = vsyncpa [#allocation3 + $0x1], 1 }
 0x124   :  { %396 = vsyncpa [#allocation6], 1 }
 0x125   :  { %398 = vsyncpa [#allocation6 + $0x1], 1 }
 0x126   :  { %399 = vsyncpa [#allocation4], 1 }
 0x127   :  { %401 = vsyncpa [#allocation4 + $0x1], 1 }

</bundles_post_ra>
